<compile_context>
chip_gen: v6e
topology: v6e:2x2x1
jax: 0.10.0
libtpu: 0.0.40
codegen_flags: <defaults>
</compile_context>

<pallas_src>
import functools

import jax
import jax.numpy as jnp
from jax import lax
from jax.experimental import pallas as pl
from jax.experimental.pallas import tpu as pltpu


_INV_SQRT2 = 0.7071067811865476


# ---------------------------------------------------------------------------
# In-kernel helpers
# ---------------------------------------------------------------------------
def _layernorm(x, gamma, beta, eps=1e-5):
    mean = jnp.mean(x, axis=-1, keepdims=True)
    centered = x - mean
    var = jnp.mean(centered * centered, axis=-1, keepdims=True)
    return centered * lax.rsqrt(var + eps) * gamma + beta


def _gelu_exact(x):
    # torch.nn.GELU() default = exact erf-based GELU
    # TODO(synk): tanh-approx GELU (or bf16 erf on v6e/v7x) if EUP is the binding slot.
    return 0.5 * x * (1.0 + lax.erf(x * _INV_SQRT2))


# ---------------------------------------------------------------------------
# Kernel 1: QKV projection with head-major outputs.   grid = (B, n_seq_tiles)
# ---------------------------------------------------------------------------
def qkv_proj_kernel(x_ref, wq_ref, bq_ref, wk_ref, bk_ref, wv_ref, bv_ref,
                    q_ref, k_ref, v_ref, *, nhead, scale):
    TS, D = x_ref.shape[1], x_ref.shape[2]
    hd = D // nhead
    cdt = q_ref.dtype

    x = x_ref[0].astype(cdt)                                            # (TS, D)
    q = (jnp.dot(x, wq_ref[...], preferred_element_type=jnp.float32)
         + bq_ref[0]) * scale                                           # scale applied once
    k = jnp.dot(x, wk_ref[...], preferred_element_type=jnp.float32) + bk_ref[0]
    v = jnp.dot(x, wv_ref[...], preferred_element_type=jnp.float32) + bv_ref[0]
    q = q.astype(cdt)
    k = k.astype(cdt)
    v = v.astype(cdt)

    # Head-major relayout hoisted out of the attention hot path (static lane slices).
    for h in range(nhead):
        sl = slice(h * hd, (h + 1) * hd)
        q_ref[0, h] = q[:, sl]
        k_ref[0, h] = k[:, sl]
        v_ref[0, h] = v[:, sl]


# ---------------------------------------------------------------------------
# Kernel 2: fused attention + FFN encoder layer.   grid = (B, n_q_tiles, n_f_chunks)
# ---------------------------------------------------------------------------
def fused_encoder_kernel(x_ref, q_ref, k_ref, v_ref,
                         wout_ref, bout_ref, g1_ref, bt1_ref,
                         w1_ref, b1_ref, w2_ref, b2_ref, g2_ref, bt2_ref,
                         o_ref,
                         ln1_sc, acc_sc,
                         *, nhead, kv_chunk, approx_recip, exp_in_cdt):
    fk = pl.program_id(2)
    nfk = pl.num_programs(2)

    TQ, D = x_ref.shape[1], x_ref.shape[2]
    hd = D // nhead
    S = k_ref.shape[2]
    n_kv = S // kv_chunk
    cdt = k_ref.dtype

    # ---- once per (batch, q-tile): online-softmax attention + out-proj + LN1 ----
    @pl.when(fk == 0)
    def _():
        x_q = x_ref[0]                                                  # (TQ, D) f32
        qh = q_ref[0]                                                   # (H, TQ, hd), pre-scaled

        def kv_step(c, carry):
            m, l, acc = carry
            start = pl.multiple_of(c * kv_chunk, kv_chunk)
            k_c = k_ref[0, :, pl.ds(start, kv_chunk), :]                # (H, TKV, hd)
            v_c = v_ref[0, :, pl.ds(start, kv_chunk), :]
            s = jnp.einsum("hqd,hkd->hqk", qh, k_c,
                           preferred_element_type=jnp.float32)          # (H, TQ, TKV)
            m_new = jnp.maximum(m, jnp.max(s, axis=-1, keepdims=True))
            alpha = jnp.exp(m - m_new)
            if exp_in_cdt:
                # bf16 exp (EUP bf16 path on v6e/v7x); running stats stay f32.
                p = jnp.exp((s - m_new).astype(cdt))
                p_sum = jnp.sum(p.astype(jnp.float32), axis=-1, keepdims=True)
            else:
                p = jnp.exp(s - m_new)
                p_sum = jnp.sum(p, axis=-1, keepdims=True)
            pv = jnp.einsum("hqk,hkd->hqd", p.astype(cdt), v_c,
                            preferred_element_type=jnp.float32)         # (H, TQ, hd)
            return m_new, alpha * l + p_sum, alpha * acc + pv

        m0 = jnp.full((nhead, TQ, 1), -jnp.inf, dtype=jnp.float32)
        l0 = jnp.zeros((nhead, TQ, 1), dtype=jnp.float32)
        a0 = jnp.zeros((nhead, TQ, hd), dtype=jnp.float32)
        m_i, l_i, acc = lax.fori_loop(0, n_kv, kv_step, (m0, l0, a0),
                                      unroll=(n_kv <= 8))

        # Deferred softmax denominator: scale (H,TQ,hd) once instead of (H,TQ,S).
        ctx = acc * pl.reciprocal(l_i, approx=approx_recip)
        ctx_flat = jnp.concatenate([ctx[h] for h in range(nhead)], axis=-1)   # (TQ, D)

        proj = jnp.dot(ctx_flat.astype(cdt), wout_ref[...],
                       preferred_element_type=jnp.float32) + bout_ref[0]
        res1 = x_q + proj                                               # dropout1 = identity
        ln1_sc[...] = _layernorm(res1, g1_ref[0], bt1_ref[0])
        acc_sc[...] = jnp.zeros_like(acc_sc)

    # ---- every f-chunk: linear1 chunk -> GELU -> linear2 chunk accumulate ----
    h1 = jnp.dot(ln1_sc[...].astype(cdt), w1_ref[...],
                 preferred_element_type=jnp.float32) + b1_ref[0]
    h1 = _gelu_exact(h1)                                                # dropout = identity
    acc_sc[...] += jnp.dot(h1.astype(cdt), w2_ref[...],
                           preferred_element_type=jnp.float32)

    # ---- last f-chunk: bias + residual + LN2 -> output ----
    @pl.when(fk == nfk - 1)
    def _():
        res2 = ln1_sc[...] + acc_sc[...] + b2_ref[0]                    # dropout2 = identity
        o_ref[0] = _layernorm(res2, g2_ref[0], bt2_ref[0]).astype(o_ref.dtype)


# ---------------------------------------------------------------------------
# Wrapper helpers
# ---------------------------------------------------------------------------
def _round_up(v, m):
    return -(-v // m) * m


def _padded_block_bytes(shape, dtype):
    """VMEM bytes for one buffer of a block, with (sublane, lane) tile padding."""
    it = jnp.dtype(dtype).itemsize
    dims = list(shape)
    dims[-1] = _round_up(dims[-1], 128)
    if len(dims) >= 2:
        dims[-2] = _round_up(dims[-2], 8 * max(1, 4 // it))
    n = 1
    for d in dims:
        n *= d
    return n * it


def _vmem_limit(in_blocks, out_blocks, scratch_blocks, temp_bytes):
    total = sum(2 * _padded_block_bytes(s, d) for s, d in in_blocks)    # double-buffered
    total += sum(2 * _padded_block_bytes(s, d) for s, d in out_blocks)
    total += sum(_padded_block_bytes(s, d) for s, d in scratch_blocks)
    total += temp_bytes
    total = int(total * 1.25) + (4 << 20)                               # headroom
    cap = 128 << 20
    try:
        cap = int(pltpu.get_tpu_info().vmem_capacity_bytes)
    except Exception:
        pass
    return max(32 << 20, min(total, cap))


def _pick_tile(total, target, granule):
    """Largest divisor of `total` <= target that is a multiple of `granule`.
    Falls back to the full extent, which is always a legal Pallas block."""
    if total <= target:
        return total
    for cand in range(min(target, total), 0, -1):
        if total % cand == 0 and cand % granule == 0:
            return cand
    return total


# ---------------------------------------------------------------------------
# Wrapper
# ---------------------------------------------------------------------------
def transformer_encoder_layer(x, params, *, nhead,
                              compute_dtype=jnp.float32,
                              q_tile_target=256,          # v7x-friendly defaults
                              f_tile_target=1024,
                              kv_chunk_target=512,
                              proj_seq_tile_target=512,
                              ffn_weight_budget_bytes=16 << 20):
    """x: (B, S, D) float32 -> (B, S, D) float32 (eval-mode TransformerEncoderLayer)."""
    B, S, D = x.shape
    F = params["w1"].shape[1]
    assert D % nhead == 0
    hd = D // nhead
    out_dtype = x.dtype
    cdt = jnp.dtype(compute_dtype)
    csize = cdt.itemsize
    bf16_math = cdt == jnp.dtype(jnp.bfloat16)
    scale = 1.0 / float(hd) ** 0.5

    # Split the fused QKV weights once in the wrapper so no kernel slices a weight lane axis.
    wqkv, bqkv = params["wqkv"], params["bqkv"]
    wq, wk, wv = wqkv[:, :D], wqkv[:, D:2 * D], wqkv[:, 2 * D:]
    bq, bk, bv = bqkv[:, :D], bqkv[:, D:2 * D], bqkv[:, 2 * D:]

    cast = lambda a: a.astype(cdt)
    wq, wk, wv = cast(wq), cast(wk), cast(wv)
    wout, w1, w2 = cast(params["wout"]), cast(params["w1"]), cast(params["w2"])

    sub_gran = 8 if csize >= 4 else 16          # dtype-aware sublane granule
    TS = _pick_tile(S, proj_seq_tile_target, sub_gran)
    TQ = _pick_tile(S, q_tile_target, sub_gran)
    TKV = _pick_tile(S, kv_chunk_target, sub_gran)
    # FFN weights: if W1+W2 fit the budget, use a single f-chunk so they are DMA'd once
    # per kernel instead of once per (batch, q-tile).
    if 2 * D * F * csize <= ffn_weight_budget_bytes:
        TF = F
    else:
        TF = _pick_tile(F, f_tile_target, 128)

    # ---------------- kernel 1: QKV projection, head-major outputs ----------------
    proj_in_blocks = ([((1, TS, D), x.dtype)]
                      + [((D, D), cdt), ((1, D), jnp.float32)] * 3)
    proj_out_blocks = [((1, nhead, TS, hd), cdt)] * 3
    proj_temps = 8 * _padded_block_bytes((TS, D), jnp.float32)
    proj_vmem = _vmem_limit(proj_in_blocks, proj_out_blocks, [], proj_temps)

    w_spec = pl.BlockSpec((D, D), lambda b, st: (0, 0))
    bias_spec = pl.BlockSpec((1, D), lambda b, st: (0, 0))
    hm_spec = pl.BlockSpec((1, nhead, TS, hd), lambda b, st: (b, 0, st, 0))

    q_hm, k_hm, v_hm = pl.pallas_call(
        functools.partial(qkv_proj_kernel, nhead=nhead, scale=scale),
        out_shape=tuple(jax.ShapeDtypeStruct((B, nhead, S, hd), cdt) for _ in range(3)),
        grid=(B, S // TS),
        in_specs=[pl.BlockSpec((1, TS, D), lambda b, st: (b, st, 0)),
                  w_spec, bias_spec, w_spec, bias_spec, w_spec, bias_spec],
        out_specs=(hm_spec, hm_spec, hm_spec),
        compiler_params=pltpu.CompilerParams(
            dimension_semantics=("parallel", "parallel"),
            vmem_limit_bytes=proj_vmem),
    )(x, wq, bq, wk, bk, wv, bv)

    # ---------------- kernel 2: fused attention + FFN encoder layer ----------------
    grid = (B, S // TQ, F // TF)

    const_dd = pl.BlockSpec((D, D), lambda b, qt, fk: (0, 0))
    const_1d = pl.BlockSpec((1, D), lambda b, qt, fk: (0, 0))

    in_specs = [
        pl.BlockSpec((1, TQ, D), lambda b, qt, fk: (b, qt, 0)),               # x q-tile (f32)
        pl.BlockSpec((1, nhead, TQ, hd), lambda b, qt, fk: (b, 0, qt, 0)),    # Q head-major
        pl.BlockSpec((1, nhead, S, hd), lambda b, qt, fk: (b, 0, 0, 0)),      # K (full seq)
        pl.BlockSpec((1, nhead, S, hd), lambda b, qt, fk: (b, 0, 0, 0)),      # V (full seq)
        const_dd,                                                             # Wout
        const_1d,                                                             # bout
        const_1d, const_1d,                                                   # gamma1, beta1
        pl.BlockSpec((D, TF), lambda b, qt, fk: (0, fk)),                     # W1 chunk
        pl.BlockSpec((1, TF), lambda b, qt, fk: (0, fk)),                     # b1 chunk
        pl.BlockSpec((TF, D), lambda b, qt, fk: (fk, 0)),                     # W2 chunk
        const_1d,                                                             # b2
        const_1d, const_1d,                                                   # gamma2, beta2
    ]

    main_in_blocks = [
        ((1, TQ, D), x.dtype), ((1, nhead, TQ, hd), cdt),
        ((1, nhead, S, hd), cdt), ((1, nhead, S, hd), cdt),
        ((D, D), cdt), ((1, D), jnp.float32), ((1, D), jnp.float32), ((1, D), jnp.float32),
        ((D, TF), cdt), ((1, TF), jnp.float32), ((TF, D), cdt),
        ((1, D), jnp.float32), ((1, D), jnp.float32), ((1, D), jnp.float32),
    ]
    main_out_blocks = [((1, TQ, D), out_dtype)]
    scratch_blocks = [((TQ, D), jnp.float32), ((TQ, D), jnp.float32)]
    main_temps = (4 * _padded_block_bytes((nhead, TQ, TKV), jnp.float32)
                  + 4 * _padded_block_bytes((nhead, TQ, hd), jnp.float32)
                  + 3 * _padded_block_bytes((TQ, TF), jnp.float32)
                  + 4 * _padded_block_bytes((TQ, D), jnp.float32))
    main_vmem = _vmem_limit(main_in_blocks, main_out_blocks, scratch_blocks, main_temps)

    kernel = functools.partial(
        fused_encoder_kernel,
        nhead=nhead,
        kv_chunk=TKV,
        approx_recip=bf16_math,
        exp_in_cdt=bf16_math,
    )

    return pl.pallas_call(
        kernel,
        out_shape=jax.ShapeDtypeStruct((B, S, D), out_dtype),
        grid=grid,
        in_specs=in_specs,
        out_specs=pl.BlockSpec((1, TQ, D), lambda b, qt, fk: (b, qt, 0)),
        scratch_shapes=[pltpu.VMEM((TQ, D), jnp.float32),    # LN1 output (current q tile)
                        pltpu.VMEM((TQ, D), jnp.float32)],   # FFN accumulator
        compiler_params=pltpu.CompilerParams(
            dimension_semantics=("parallel", "parallel", "arbitrary"),
            vmem_limit_bytes=main_vmem),
    )(x, q_hm, k_hm, v_hm,
      wout, params["bout"], params["g1"], params["bt1"],
      w1, params["b1"], w2, params["b2"],
      params["g2"], params["bt2"])


# ---------------------------------------------------------------------------
# Pure-JAX reference (mirrors torch semantics, eval-mode dropout)
# ---------------------------------------------------------------------------
def ref_forward(x, params, *, nhead):
    B, S, D = x.shape
    hd = D // nhead
    scale = 1.0 / (hd ** 0.5)

    qkv = x @ params["wqkv"] + params["bqkv"][0]                  # (B, S, 3D)
    q, k, v = qkv[..., :D], qkv[..., D:2 * D], qkv[..., 2 * D:]
    q = q.reshape(B, S, nhead, hd).transpose(0, 2, 1, 3) * scale
    k = k.reshape(B, S, nhead, hd).transpose(0, 2, 1, 3)
    v = v.reshape(B, S, nhead, hd).transpose(0, 2, 1, 3)
    s = jnp.einsum("bhqd,bhkd->bhqk", q, k)
    p = jax.nn.softmax(s, axis=-1)
    a = jnp.einsum("bhqk,bhkd->bhqd", p, v)
    a = a.transpose(0, 2, 1, 3).reshape(B, S, D)
    proj = a @ params["wout"] + params["bout"][0]

    src = x + proj
    mean = src.mean(-1, keepdims=True)
    var = ((src - mean) ** 2).mean(-1, keepdims=True)
    src = (src - mean) / jnp.sqrt(var + 1e-5) * params["g1"][0] + params["bt1"][0]

    h = src @ params["w1"] + params["b1"][0]
    h = jax.nn.gelu(h, approximate=False)
    y = h @ params["w2"] + params["b2"][0]
    src2 = src + y
    mean = src2.mean(-1, keepdims=True)
    var = ((src2 - mean) ** 2).mean(-1, keepdims=True)
    return (src2 - mean) / jnp.sqrt(var + 1e-5) * params["g2"][0] + params["bt2"][0]


# ---------------------------------------------------------------------------
# Main
# ---------------------------------------------------------------------------
if __name__ == "__main__":
    B, S, D, H, F = 2, 8, 32, 4, 64   # batch, seq, d_model, nhead, dim_feedforward

    key = jax.random.PRNGKey(0)
    ks = jax.random.split(key, 13)

    def init(k, shape, s):
        return jax.random.normal(k, shape, jnp.float32) * s

    params = {
        "wqkv": init(ks[0], (D, 3 * D), 1.0 / (D ** 0.5)),
        "bqkv": init(ks[1], (1, 3 * D), 0.02),
        "wout": init(ks[2], (D, D), 1.0 / (D ** 0.5)),
        "bout": init(ks[3], (1, D), 0.02),
        "g1": 1.0 + init(ks[4], (1, D), 0.05),
        "bt1": init(ks[5], (1, D), 0.05),
        "w1": init(ks[6], (D, F), 1.0 / (D ** 0.5)),
        "b1": init(ks[7], (1, F), 0.02),
        "w2": init(ks[8], (F, D), 1.0 / (F ** 0.5)),
        "b2": init(ks[9], (1, D), 0.02),
        "g2": 1.0 + init(ks[10], (1, D), 0.05),
        "bt2": init(ks[11], (1, D), 0.05),
    }

    x = jax.random.normal(ks[12], (B, S, D), jnp.float32)

    ref = ref_forward(x, params, nhead=H)

    # --- f32 path: tight tolerance ---
    out = transformer_encoder_layer(x, params, nhead=H, compute_dtype=jnp.float32)
    out = jax.block_until_ready(out)
    assert out.shape == (B, S, D)
    assert bool(jnp.all(jnp.isfinite(out)))
    err = float(jnp.max(jnp.abs(out - ref)))
    assert err < 1e-4, f"f32 max abs err {err}"

    # --- bf16 matmul-operand path: loose tolerance (f32 accumulation / LN / residuals) ---
    out_bf16 = transformer_encoder_layer(x, params, nhead=H, compute_dtype=jnp.bfloat16)
    out_bf16 = jax.block_until_ready(out_bf16)
    assert bool(jnp.all(jnp.isfinite(out_bf16)))
    err_bf16 = float(jnp.max(jnp.abs(out_bf16 - ref)))
    assert err_bf16 < 2e-1, f"bf16 max abs err {err_bf16}"

    print("KERNEL_OK")
</pallas_src>

<mosaic_0001>
module attributes {stable_mosaic.version = 11 : i64} {
  func.func @qkv_proj_kernel(%arg0: i32, %arg1: i32, %arg2: memref<1x8x32xf32, #tpu.memory_space<vmem>>, %arg3: memref<32x32xf32, #tpu.memory_space<vmem>>, %arg4: memref<1x32xf32, #tpu.memory_space<vmem>>, %arg5: memref<32x32xf32, #tpu.memory_space<vmem>>, %arg6: memref<1x32xf32, #tpu.memory_space<vmem>>, %arg7: memref<32x32xf32, #tpu.memory_space<vmem>>, %arg8: memref<1x32xf32, #tpu.memory_space<vmem>>, %arg9: memref<1x4x8x8xf32, #tpu.memory_space<vmem>>, %arg10: memref<1x4x8x8xf32, #tpu.memory_space<vmem>>, %arg11: memref<1x4x8x8xf32, #tpu.memory_space<vmem>>) attributes {dimension_semantics = [#tpu.dimension_semantics<parallel>, #tpu.dimension_semantics<parallel>], iteration_bounds = array<i64: 2, 1>, scalar_prefetch = 0 : i64, scratch_operands = 0 : i64, tpu.core_type = #tpu.core_type<tc>, window_params = [{transform_indices = @transform_0, window_bounds = array<i64: 1, 8, 32>}, {pipeline_mode = #tpu.pipeline_mode<synchronous>, transform_indices = @transform_1, window_bounds = array<i64: 32, 32>}, {pipeline_mode = #tpu.pipeline_mode<synchronous>, transform_indices = @transform_2, window_bounds = array<i64: 1, 32>}, {pipeline_mode = #tpu.pipeline_mode<synchronous>, transform_indices = @transform_3, window_bounds = array<i64: 32, 32>}, {pipeline_mode = #tpu.pipeline_mode<synchronous>, transform_indices = @transform_4, window_bounds = array<i64: 1, 32>}, {pipeline_mode = #tpu.pipeline_mode<synchronous>, transform_indices = @transform_5, window_bounds = array<i64: 32, 32>}, {pipeline_mode = #tpu.pipeline_mode<synchronous>, transform_indices = @transform_6, window_bounds = array<i64: 1, 32>}, {transform_indices = @transform_7, window_bounds = array<i64: 1, 4, 8, 8>}, {transform_indices = @transform_8, window_bounds = array<i64: 1, 4, 8, 8>}, {transform_indices = @transform_9, window_bounds = array<i64: 1, 4, 8, 8>}]} {
    %c0 = arith.constant 0 : index
    %c0_0 = arith.constant 0 : index
    %c0_1 = arith.constant 0 : index
    %0 = vector.load %arg2[%c0, %c0_0, %c0_1] : memref<1x8x32xf32, #tpu.memory_space<vmem>>, vector<1x8x32xf32>
    %1 = vector.shape_cast %0 : vector<1x8x32xf32> to vector<8x32xf32>
    %c0_2 = arith.constant 0 : index
    %c0_3 = arith.constant 0 : index
    %2 = vector.load %arg3[%c0_2, %c0_3] : memref<32x32xf32, #tpu.memory_space<vmem>>, vector<32x32xf32>
    %cst = arith.constant dense<0.000000e+00> : vector<8x32xf32>
    %3 = tpu.matmul %1, %2, %cst {dimension_numbers = #tpu.dot_dimension_numbers<[1], [0], [0], [1], [0, 0, 1, 1], [], []>} : vector<8x32xf32>, vector<32x32xf32>, vector<8x32xf32> -> vector<8x32xf32>
    %c0_4 = arith.constant 0 : index
    %c0_5 = arith.constant 0 : index
    %4 = vector.load %arg4[%c0_4, %c0_5] : memref<1x32xf32, #tpu.memory_space<vmem>>, vector<1x32xf32>
    %5 = vector.shape_cast %4 : vector<1x32xf32> to vector<32xf32>
    %6 = vector.shape_cast %5 : vector<32xf32> to vector<1x32xf32>
    %7 = vector.broadcast %6 : vector<1x32xf32> to vector<8x32xf32>
    %8 = arith.addf %3, %7 : vector<8x32xf32>
    %cst_6 = arith.constant 0.353553385 : f32
    %9 = vector.broadcast %cst_6 : f32 to vector<8x32xf32>
    %10 = arith.mulf %8, %9 : vector<8x32xf32>
    %c0_7 = arith.constant 0 : index
    %c0_8 = arith.constant 0 : index
    %11 = vector.load %arg5[%c0_7, %c0_8] : memref<32x32xf32, #tpu.memory_space<vmem>>, vector<32x32xf32>
    %cst_9 = arith.constant dense<0.000000e+00> : vector<8x32xf32>
    %12 = tpu.matmul %1, %11, %cst_9 {dimension_numbers = #tpu.dot_dimension_numbers<[1], [0], [0], [1], [0, 0, 1, 1], [], []>} : vector<8x32xf32>, vector<32x32xf32>, vector<8x32xf32> -> vector<8x32xf32>
    %c0_10 = arith.constant 0 : index
    %c0_11 = arith.constant 0 : index
    %13 = vector.load %arg6[%c0_10, %c0_11] : memref<1x32xf32, #tpu.memory_space<vmem>>, vector<1x32xf32>
    %14 = vector.shape_cast %13 : vector<1x32xf32> to vector<32xf32>
    %15 = vector.shape_cast %14 : vector<32xf32> to vector<1x32xf32>
    %16 = vector.broadcast %15 : vector<1x32xf32> to vector<8x32xf32>
    %17 = arith.addf %12, %16 : vector<8x32xf32>
    %c0_12 = arith.constant 0 : index
    %c0_13 = arith.constant 0 : index
    %18 = vector.load %arg7[%c0_12, %c0_13] : memref<32x32xf32, #tpu.memory_space<vmem>>, vector<32x32xf32>
    %cst_14 = arith.constant dense<0.000000e+00> : vector<8x32xf32>
    %19 = tpu.matmul %1, %18, %cst_14 {dimension_numbers = #tpu.dot_dimension_numbers<[1], [0], [0], [1], [0, 0, 1, 1], [], []>} : vector<8x32xf32>, vector<32x32xf32>, vector<8x32xf32> -> vector<8x32xf32>
    %c0_15 = arith.constant 0 : index
    %c0_16 = arith.constant 0 : index
    %20 = vector.load %arg8[%c0_15, %c0_16] : memref<1x32xf32, #tpu.memory_space<vmem>>, vector<1x32xf32>
    %21 = vector.shape_cast %20 : vector<1x32xf32> to vector<32xf32>
    %22 = vector.shape_cast %21 : vector<32xf32> to vector<1x32xf32>
    %23 = vector.broadcast %22 : vector<1x32xf32> to vector<8x32xf32>
    %24 = arith.addf %19, %23 : vector<8x32xf32>
    %25 = vector.extract_strided_slice %10 {offsets = [0, 0], sizes = [8, 8], strides = [1, 1]} : vector<8x32xf32> to vector<8x8xf32>
    %c0_17 = arith.constant 0 : index
    %c0_18 = arith.constant 0 : index
    %c0_19 = arith.constant 0 : index
    %c0_20 = arith.constant 0 : index
    %26 = vector.load %arg9[%c0_17, %c0_18, %c0_19, %c0_20] : memref<1x4x8x8xf32, #tpu.memory_space<vmem>>, vector<1x1x8x8xf32>
    %27 = vector.shape_cast %26 : vector<1x1x8x8xf32> to vector<8x8xf32>
    %28 = vector.shape_cast %25 : vector<8x8xf32> to vector<1x1x8x8xf32>
    tpu.vector_store %arg9[%c0_17, %c0_18, %c0_19, %c0_20], %28 {strides = array<i32>} : memref<1x4x8x8xf32, #tpu.memory_space<vmem>>, vector<1x1x8x8xf32>,
    %29 = vector.extract_strided_slice %17 {offsets = [0, 0], sizes = [8, 8], strides = [1, 1]} : vector<8x32xf32> to vector<8x8xf32>
    %c0_21 = arith.constant 0 : index
    %c0_22 = arith.constant 0 : index
    %c0_23 = arith.constant 0 : index
    %c0_24 = arith.constant 0 : index
    %30 = vector.load %arg10[%c0_21, %c0_22, %c0_23, %c0_24] : memref<1x4x8x8xf32, #tpu.memory_space<vmem>>, vector<1x1x8x8xf32>
    %31 = vector.shape_cast %30 : vector<1x1x8x8xf32> to vector<8x8xf32>
    %32 = vector.shape_cast %29 : vector<8x8xf32> to vector<1x1x8x8xf32>
    tpu.vector_store %arg10[%c0_21, %c0_22, %c0_23, %c0_24], %32 {strides = array<i32>} : memref<1x4x8x8xf32, #tpu.memory_space<vmem>>, vector<1x1x8x8xf32>,
    %33 = vector.extract_strided_slice %24 {offsets = [0, 0], sizes = [8, 8], strides = [1, 1]} : vector<8x32xf32> to vector<8x8xf32>
    %c0_25 = arith.constant 0 : index
    %c0_26 = arith.constant 0 : index
    %c0_27 = arith.constant 0 : index
    %c0_28 = arith.constant 0 : index
    %34 = vector.load %arg11[%c0_25, %c0_26, %c0_27, %c0_28] : memref<1x4x8x8xf32, #tpu.memory_space<vmem>>, vector<1x1x8x8xf32>
    %35 = vector.shape_cast %34 : vector<1x1x8x8xf32> to vector<8x8xf32>
    %36 = vector.shape_cast %33 : vector<8x8xf32> to vector<1x1x8x8xf32>
    tpu.vector_store %arg11[%c0_25, %c0_26, %c0_27, %c0_28], %36 {strides = array<i32>} : memref<1x4x8x8xf32, #tpu.memory_space<vmem>>, vector<1x1x8x8xf32>,
    %37 = vector.extract_strided_slice %10 {offsets = [0, 8], sizes = [8, 8], strides = [1, 1]} : vector<8x32xf32> to vector<8x8xf32>
    %c0_29 = arith.constant 0 : index
    %c1 = arith.constant 1 : index
    %c0_30 = arith.constant 0 : index
    %c0_31 = arith.constant 0 : index
    %38 = vector.load %arg9[%c0_29, %c1, %c0_30, %c0_31] : memref<1x4x8x8xf32, #tpu.memory_space<vmem>>, vector<1x1x8x8xf32>
    %39 = vector.shape_cast %38 : vector<1x1x8x8xf32> to vector<8x8xf32>
    %40 = vector.shape_cast %37 : vector<8x8xf32> to vector<1x1x8x8xf32>
    tpu.vector_store %arg9[%c0_29, %c1, %c0_30, %c0_31], %40 {strides = array<i32>} : memref<1x4x8x8xf32, #tpu.memory_space<vmem>>, vector<1x1x8x8xf32>,
    %41 = vector.extract_strided_slice %17 {offsets = [0, 8], sizes = [8, 8], strides = [1, 1]} : vector<8x32xf32> to vector<8x8xf32>
    %c0_32 = arith.constant 0 : index
    %c1_33 = arith.constant 1 : index
    %c0_34 = arith.constant 0 : index
    %c0_35 = arith.constant 0 : index
    %42 = vector.load %arg10[%c0_32, %c1_33, %c0_34, %c0_35] : memref<1x4x8x8xf32, #tpu.memory_space<vmem>>, vector<1x1x8x8xf32>
    %43 = vector.shape_cast %42 : vector<1x1x8x8xf32> to vector<8x8xf32>
    %44 = vector.shape_cast %41 : vector<8x8xf32> to vector<1x1x8x8xf32>
    tpu.vector_store %arg10[%c0_32, %c1_33, %c0_34, %c0_35], %44 {strides = array<i32>} : memref<1x4x8x8xf32, #tpu.memory_space<vmem>>, vector<1x1x8x8xf32>,
    %45 = vector.extract_strided_slice %24 {offsets = [0, 8], sizes = [8, 8], strides = [1, 1]} : vector<8x32xf32> to vector<8x8xf32>
    %c0_36 = arith.constant 0 : index
    %c1_37 = arith.constant 1 : index
    %c0_38 = arith.constant 0 : index
    %c0_39 = arith.constant 0 : index
    %46 = vector.load %arg11[%c0_36, %c1_37, %c0_38, %c0_39] : memref<1x4x8x8xf32, #tpu.memory_space<vmem>>, vector<1x1x8x8xf32>
    %47 = vector.shape_cast %46 : vector<1x1x8x8xf32> to vector<8x8xf32>
    %48 = vector.shape_cast %45 : vector<8x8xf32> to vector<1x1x8x8xf32>
    tpu.vector_store %arg11[%c0_36, %c1_37, %c0_38, %c0_39], %48 {strides = array<i32>} : memref<1x4x8x8xf32, #tpu.memory_space<vmem>>, vector<1x1x8x8xf32>,
    %49 = vector.extract_strided_slice %10 {offsets = [0, 16], sizes = [8, 8], strides = [1, 1]} : vector<8x32xf32> to vector<8x8xf32>
    %c0_40 = arith.constant 0 : index
    %c2 = arith.constant 2 : index
    %c0_41 = arith.constant 0 : index
    %c0_42 = arith.constant 0 : index
    %50 = vector.load %arg9[%c0_40, %c2, %c0_41, %c0_42] : memref<1x4x8x8xf32, #tpu.memory_space<vmem>>, vector<1x1x8x8xf32>
    %51 = vector.shape_cast %50 : vector<1x1x8x8xf32> to vector<8x8xf32>
    %52 = vector.shape_cast %49 : vector<8x8xf32> to vector<1x1x8x8xf32>
    tpu.vector_store %arg9[%c0_40, %c2, %c0_41, %c0_42], %52 {strides = array<i32>} : memref<1x4x8x8xf32, #tpu.memory_space<vmem>>, vector<1x1x8x8xf32>,
    %53 = vector.extract_strided_slice %17 {offsets = [0, 16], sizes = [8, 8], strides = [1, 1]} : vector<8x32xf32> to vector<8x8xf32>
    %c0_43 = arith.constant 0 : index
    %c2_44 = arith.constant 2 : index
    %c0_45 = arith.constant 0 : index
    %c0_46 = arith.constant 0 : index
    %54 = vector.load %arg10[%c0_43, %c2_44, %c0_45, %c0_46] : memref<1x4x8x8xf32, #tpu.memory_space<vmem>>, vector<1x1x8x8xf32>
    %55 = vector.shape_cast %54 : vector<1x1x8x8xf32> to vector<8x8xf32>
    %56 = vector.shape_cast %53 : vector<8x8xf32> to vector<1x1x8x8xf32>
    tpu.vector_store %arg10[%c0_43, %c2_44, %c0_45, %c0_46], %56 {strides = array<i32>} : memref<1x4x8x8xf32, #tpu.memory_space<vmem>>, vector<1x1x8x8xf32>,
    %57 = vector.extract_strided_slice %24 {offsets = [0, 16], sizes = [8, 8], strides = [1, 1]} : vector<8x32xf32> to vector<8x8xf32>
    %c0_47 = arith.constant 0 : index
    %c2_48 = arith.constant 2 : index
    %c0_49 = arith.constant 0 : index
    %c0_50 = arith.constant 0 : index
    %58 = vector.load %arg11[%c0_47, %c2_48, %c0_49, %c0_50] : memref<1x4x8x8xf32, #tpu.memory_space<vmem>>, vector<1x1x8x8xf32>
    %59 = vector.shape_cast %58 : vector<1x1x8x8xf32> to vector<8x8xf32>
    %60 = vector.shape_cast %57 : vector<8x8xf32> to vector<1x1x8x8xf32>
    tpu.vector_store %arg11[%c0_47, %c2_48, %c0_49, %c0_50], %60 {strides = array<i32>} : memref<1x4x8x8xf32, #tpu.memory_space<vmem>>, vector<1x1x8x8xf32>,
    %61 = vector.extract_strided_slice %10 {offsets = [0, 24], sizes = [8, 8], strides = [1, 1]} : vector<8x32xf32> to vector<8x8xf32>
    %c0_51 = arith.constant 0 : index
    %c3 = arith.constant 3 : index
    %c0_52 = arith.constant 0 : index
    %c0_53 = arith.constant 0 : index
    %62 = vector.load %arg9[%c0_51, %c3, %c0_52, %c0_53] : memref<1x4x8x8xf32, #tpu.memory_space<vmem>>, vector<1x1x8x8xf32>
    %63 = vector.shape_cast %62 : vector<1x1x8x8xf32> to vector<8x8xf32>
    %64 = vector.shape_cast %61 : vector<8x8xf32> to vector<1x1x8x8xf32>
    tpu.vector_store %arg9[%c0_51, %c3, %c0_52, %c0_53], %64 {strides = array<i32>} : memref<1x4x8x8xf32, #tpu.memory_space<vmem>>, vector<1x1x8x8xf32>,
    %65 = vector.extract_strided_slice %17 {offsets = [0, 24], sizes = [8, 8], strides = [1, 1]} : vector<8x32xf32> to vector<8x8xf32>
    %c0_54 = arith.constant 0 : index
    %c3_55 = arith.constant 3 : index
    %c0_56 = arith.constant 0 : index
    %c0_57 = arith.constant 0 : index
    %66 = vector.load %arg10[%c0_54, %c3_55, %c0_56, %c0_57] : memref<1x4x8x8xf32, #tpu.memory_space<vmem>>, vector<1x1x8x8xf32>
    %67 = vector.shape_cast %66 : vector<1x1x8x8xf32> to vector<8x8xf32>
    %68 = vector.shape_cast %65 : vector<8x8xf32> to vector<1x1x8x8xf32>
    tpu.vector_store %arg10[%c0_54, %c3_55, %c0_56, %c0_57], %68 {strides = array<i32>} : memref<1x4x8x8xf32, #tpu.memory_space<vmem>>, vector<1x1x8x8xf32>,
    %69 = vector.extract_strided_slice %24 {offsets = [0, 24], sizes = [8, 8], strides = [1, 1]} : vector<8x32xf32> to vector<8x8xf32>
    %c0_58 = arith.constant 0 : index
    %c3_59 = arith.constant 3 : index
    %c0_60 = arith.constant 0 : index
    %c0_61 = arith.constant 0 : index
    %70 = vector.load %arg11[%c0_58, %c3_59, %c0_60, %c0_61] : memref<1x4x8x8xf32, #tpu.memory_space<vmem>>, vector<1x1x8x8xf32>
    %71 = vector.shape_cast %70 : vector<1x1x8x8xf32> to vector<8x8xf32>
    %72 = vector.shape_cast %69 : vector<8x8xf32> to vector<1x1x8x8xf32>
    tpu.vector_store %arg11[%c0_58, %c3_59, %c0_60, %c0_61], %72 {strides = array<i32>} : memref<1x4x8x8xf32, #tpu.memory_space<vmem>>, vector<1x1x8x8xf32>,
    return
  }
  func.func @transform_0(%arg0: i32, %arg1: i32) -> (i32, i32, i32) {
    %c0_i32 = arith.constant 0 : i32
    %c0_i32_0 = arith.constant 0 : i32
    return %arg0, %arg1, %c0_i32 : i32, i32, i32
  }
  func.func @transform_1(%arg0: i32, %arg1: i32) -> (i32, i32) {
    %c0_i32 = arith.constant 0 : i32
    %c0_i32_0 = arith.constant 0 : i32
    %c0_i32_1 = arith.constant 0 : i32
    return %c0_i32, %c0_i32_0 : i32, i32
  }
  func.func @transform_2(%arg0: i32, %arg1: i32) -> (i32, i32) {
    %c0_i32 = arith.constant 0 : i32
    %c0_i32_0 = arith.constant 0 : i32
    %c0_i32_1 = arith.constant 0 : i32
    return %c0_i32, %c0_i32_0 : i32, i32
  }
  func.func @transform_3(%arg0: i32, %arg1: i32) -> (i32, i32) {
    %c0_i32 = arith.constant 0 : i32
    %c0_i32_0 = arith.constant 0 : i32
    %c0_i32_1 = arith.constant 0 : i32
    return %c0_i32, %c0_i32_0 : i32, i32
  }
  func.func @transform_4(%arg0: i32, %arg1: i32) -> (i32, i32) {
    %c0_i32 = arith.constant 0 : i32
    %c0_i32_0 = arith.constant 0 : i32
    %c0_i32_1 = arith.constant 0 : i32
    return %c0_i32, %c0_i32_0 : i32, i32
  }
  func.func @transform_5(%arg0: i32, %arg1: i32) -> (i32, i32) {
    %c0_i32 = arith.constant 0 : i32
    %c0_i32_0 = arith.constant 0 : i32
    %c0_i32_1 = arith.constant 0 : i32
    return %c0_i32, %c0_i32_0 : i32, i32
  }
  func.func @transform_6(%arg0: i32, %arg1: i32) -> (i32, i32) {
    %c0_i32 = arith.constant 0 : i32
    %c0_i32_0 = arith.constant 0 : i32
    %c0_i32_1 = arith.constant 0 : i32
    return %c0_i32, %c0_i32_0 : i32, i32
  }
  func.func @transform_7(%arg0: i32, %arg1: i32) -> (i32, i32, i32, i32) {
    %c0_i32 = arith.constant 0 : i32
    %c0_i32_0 = arith.constant 0 : i32
    %c0_i32_1 = arith.constant 0 : i32
    return %arg0, %c0_i32, %arg1, %c0_i32_0 : i32, i32, i32, i32
  }
  func.func @transform_8(%arg0: i32, %arg1: i32) -> (i32, i32, i32, i32) {
    %c0_i32 = arith.constant 0 : i32
    %c0_i32_0 = arith.constant 0 : i32
    %c0_i32_1 = arith.constant 0 : i32
    return %arg0, %c0_i32, %arg1, %c0_i32_0 : i32, i32, i32, i32
  }
  func.func @transform_9(%arg0: i32, %arg1: i32) -> (i32, i32, i32, i32) {
    %c0_i32 = arith.constant 0 : i32
    %c0_i32_0 = arith.constant 0 : i32
    %c0_i32_1 = arith.constant 0 : i32
    return %arg0, %c0_i32, %arg1, %c0_i32_0 : i32, i32, i32, i32
  }
}

</mosaic_0001>

<bundles_post_ra>
// kernel: tpu_custom_call.1
= control target key start
LH: loop header
LB: loop body
LE: loop exit
PB: predicated region body
PF: predicated region fallthrough
CT: control target
= control target key end

     0   :  { %s1818_s0 = inlined_call_operand.hbm [shape: f32[2,8,32], index: 0, kind: input, shape index: {}]   ;;  %s1819_s1 = inlined_call_operand.hbm [shape: f32[32,32], index: 1, kind: input, shape index: {}]   ;;  %s1820_s2 = inlined_call_operand.vmem [shape: f32[1,32], index: 2, kind: input, shape index: {}]   ;;  %s1821_s3 = inlined_call_operand.hbm [shape: f32[32,32], index: 3, kind: input, shape index: {}]   ;;  %s1822_s4 = inlined_call_operand.vmem [shape: f32[1,32], index: 4, kind: input, shape index: {}]   ;;  %s1823_s5 = inlined_call_operand.hbm [shape: f32[32,32], index: 5, kind: input, shape index: {}]   ;;  %s1824_s6 = inlined_call_operand.vmem [shape: f32[1,32], index: 6, kind: input, shape index: {}]   ;;  %s1825_s7 = inlined_call_operand.hbm [shape: f32[2,4,8,8], index: 7, kind: output, shape index: {0}]   ;;  %s1826_s8 = inlined_call_operand.hbm [shape: f32[2,4,8,8], index: 8, kind: output, shape index: {1}]   ;;  %s1827_s9 = inlined_call_operand.hbm [shape: f32[2,4,8,8], index: 9, kind: output, shape index: {2}]  }
   0x1   :  { %1833 = sst [smem:[#allocation21_spill]] %s1819_s1 }
   0x2   :  { %1834 = sst [smem:[#allocation22_spill]] %s1821_s3 }
   0x3   :  { %1835 = sst [smem:[#allocation23_spill]] %s1823_s5 }
   0x4   :  { %15 = vsyncpa [#allocation3], 0 }
   0x5   :  { %17 = vsyncpa [#allocation3 + $0x1], 0 }
   0x6   :  { %18 = vsyncpa [#allocation6], 0 }
   0x7   :  { %19 = vsyncpa [#allocation9], 0 }
   0x8   :  { %20 = vsyncpa [#allocation4], 0 }
   0x9   :  { %22 = vsyncpa [#allocation4 + $0x1], 0 }
   0xa   :  { %23 = vsyncpa [#allocation12], 0 }
   0xb   :  { %25 = vsyncpa [#allocation12 + $0x1], 0  ;;  %s1493_s30 = smov 0   ;;  %s1495_s10 = smov 0  }
   0xc   :  { %s1497_s11 = smov 0   ;;  %s1499_s12 = smov 0  }
   0xd   :  { %s1501_s13 = smov 0   ;;  %s1503_s14 = smov 0  }
   0xe LB: > { %s1524_s15 = sadd.s32 4294967295, %s1425_s14   ;;  %s1829_s16 = sadd.s32 4294967294, %s1425_s14   ;;  %s1425_s14 = sphi %s1503_s14, %s31_s14   ;;  %s1421_s13 = sphi %s1501_s13, %s1863_s13   ;;  %s1417_s12 = sphi %s1499_s12, %s1862_s12   ;;  %s1413_s11 = sphi %s1497_s11, %s1861_s11   ;;  %s1409_s10 = sphi %s1495_s10, %s1860_s10   ;;  %s1405_s30 = sphi %s1493_s30, %s1859_s30  }
   0xf   : > { %p65_p0 = scmp.ne.s32.totalorder %s1409_s10, %s1405_s30  ;;  %p1828_p1 = scmp.eq.s32.totalorder %s1524_s15, 0 }
  0x10   : > { %p223_p3 = scmp.eq.s32.totalorder %s1829_s16, 1  ;;  %p971_p5 = scmp.ge.s32.totalorder %s1425_s14, 1 }
  0x11   : > { %p1535_p4 = por %p1828_p1, %p65_p0  ;;  %p286_p7 = scmp.lt.s32.totalorder %s1425_s14, 3 }
  0x12   : > { %p1540_p6 = por %p223_p3, %p65_p0  ;;  %s1427_s20 = smov [#allocation5]  }
  0x13   : > { %s1836_s17 = scalar_select %p1535_p4, 1, 0 }
  0x14   : > { %s1837_s18 = scalar_select %p1540_p6, 1, 0 }
  0x15   : > { %p1545_p8 = pnand %p971_p5, %p286_p7  ;;  %s298_s21 = sshll.u32 %s1427_s20, 4  ;;  %s299_s21 = int_to_ptr.vmem [resolvable:$true] %s298_s21 }
  0x16   : > { %1838 = sst [smem:[#allocation19_spill]] %s1837_s18  ;;  %s1428_s23 = smov [#allocation7]  }
  0x17   : > { %p1083_p9 = pneg %p1545_p8  ;;  %s314_s24 = sshll.u32 %s1428_s23, 4  ;;  %s315_s24 = int_to_ptr.vmem [resolvable:$true] %s314_s24 }
  0x18   : > { %s1429_s25 = smov [#allocation8]   ;;  %s1186_s27 = scalar_lea.vmem %s299_s21, 512 }
  0x19   : > { %p1554_p11 = pnand %p1083_p9, %p1828_p1  ;;  %s330_s26 = sshll.u32 %s1429_s25, 4  ;;  %s331_s26 = int_to_ptr.vmem [resolvable:$true] %s330_s26 }
  0x1a   : > { %p1187_p13 = scmp.ne.s32.totalorder %s299_s21, %s1186_s27  ;;  %p1194_p5 = scmp.lt.s32.totalorder %s299_s21, %s299_s21 }
  0x1b   : > { %p1177_p12 = pneg %p1554_p11  ;;  %p1195_p7 = scmp.lt.s32.totalorder %s1186_s27, %s1186_s27 }
  0x1d   : > { %p1189_p0 = pnand %p1187_p13, %p1177_p12  ;;  %p1196_p9 = por %p1195_p7, %p1194_p5 }
  0x1f   : > { %p1190_p3 = pneg %p1189_p0 }
  0x21   : > { %p1197_p10 = pnand %p1196_p9, %p1190_p3 }
  0x23   : > { %1200 = shalt.err (!%p1197_p10)
}
  0x24   : > { %s1430_s28 = smov 128   ;;  %s1431_s29 = smov 8  }
  0x25   : > { %s1841_s1 = sld [smem:[#allocation21_spill]]  ;;  %s1212_s25 = scalar_lea.vmem %s315_s24, 512 }
  0x26   : > { %p1213_p1 = scmp.ne.s32.totalorder %s315_s24, %s1212_s25  ;;  %p1220_p2 = scmp.lt.s32.totalorder %s315_s24, %s315_s24 }
  0x27   : > { %p1221_p6 = scmp.lt.s32.totalorder %s1212_s25, %s1212_s25 }
  0x28   : > { %p1215_p13 = pnand %p1213_p1, %p1177_p12 }
  0x29   : > { %p1222_p5 = por %p1221_p6, %p1220_p2 }
  0x2a   : > { %p1216_p0 = pneg %p1215_p13 }
  0x2b   : > { %1086 = dma.hbm_to_vmem [thread:$0]  (!%p1554_p11), %s1841_s1, 512, %s299_s21, [#allocation6], %s1430_s28, %s1430_s28, %s1431_s29  }
  0x2c   : > { %p1223_p3 = pnand %p1222_p5, %p1216_p0 }
  0x2e   : > { %1226 = shalt.err (!%p1223_p3)
}
  0x2f   : > { %s1842_s3 = sld [smem:[#allocation22_spill]]  ;;  %s1238_s21 = scalar_lea.vmem %s331_s26, 512 }
  0x30   : > { %p1239_p10 = scmp.ne.s32.totalorder %s331_s26, %s1238_s21  ;;  %p1246_p9 = scmp.lt.s32.totalorder %s331_s26, %s331_s26 }
  0x31   : > { %p1247_p13 = scmp.lt.s32.totalorder %s1238_s21, %s1238_s21 }
  0x32   : > { %p1241_p7 = pnand %p1239_p10, %p1177_p12 }
  0x33   : > { %p1248_p4 = por %p1247_p13, %p1246_p9 }
  0x34   : > { %p1242_p1 = pneg %p1241_p7 }
  0x35   : > { %1089 = dma.hbm_to_vmem [thread:$0]  (!%p1554_p11), %s1842_s3, 512, %s315_s24, [#allocation6], %s1430_s28, %s1430_s28, %s1431_s29  }
  0x36   : > { %p1249_p2 = pnand %p1248_p4, %p1242_p1 }
  0x38   : > { %1252 = shalt.err (!%p1249_p2)
}
  0x39   : > { %s1843_s5 = sld [smem:[#allocation23_spill]]  ;;  %s52_s16 = sadd.s32 1, %s1413_s11 }
  0x3a   : > { %s43_s24 = sadd.s32 1, %s1421_s13  ;;  %p59_p4 = scmp.ne.s32.totalorder %s1413_s11, %s1409_s10 }
  0x3b   : > { %p45_p6 = scmp.ge.s32.totalorder %s43_s24, 2  ;;  %p60_p12 = scmp.eq.s32.totalorder %s1425_s14, 0 }
  0x3c   : > { %p1844_p0 = scmp.eq.s32.totalorder %s1524_s15, 1  ;;  %p1110_p3 = scmp.lt.s32.totalorder %s1425_s14, 2 }
  0x3d   : > { %s1865_s24 = smov (%p45_p6, %s43_s24), 0  ;;  %p61_p10 = por %p60_p12, %p59_p4 }
  0x3e   : > { %p1591_p5 = por %p1844_p0, %p59_p4  ;;  %1846 = sst [smem:[#allocation20_spill]] %s1865_s24 }
  0x3f   : > { %1092 = dma.hbm_to_vmem [thread:$0]  (!%p1554_p11), %s1843_s5, 512, %s331_s26, [#allocation9], %s1430_s28, %s1430_s28, %s1431_s29  }
  0x40   : > { %s347_s25 = sand.u32 1, %s1413_s11   ;;  %s47_s27 = ssub.s32 %s1421_s13, %s1865_s24 }
  0x41   : > { %p50_p7 = scmp.eq.s32.totalorder %s47_s27, 0  ;;  %s976_s26 = sshll.u32 %s347_s25, 3 }
  0x42   : > { %s977_s28 = sshll.u32 %s1421_s13, 7  ;;  %s351_s1 = scalar_lea.vmem [#allocation2], %s976_s26 }
  0x43   : > { %s1603_s29 = scalar_select %p50_p7, %s1413_s11, %s52_s16  }
  0x44   : > { %s357_s23 = scalar_lea.hbm %s1818_s0, %s977_s28  ;;  %s359_s3 = sshll.u32 %s351_s1, 4  ;;  %s360_s3 = int_to_ptr.vmem [resolvable:$true] %s359_s3 }
  0x45   : > { %p1610_p11 = pnand %p1110_p3, %p61_p10  ;;  %s348_s18 = scalar_lea.sflag [#allocation3], %s347_s25 }
  0x46   : > { %s1266_s27 = scalar_lea.vmem %s360_s3, 128  ;;  %s1432_s16 = smov [#allocation2]  }
  0x47   : > { %p1255_p1 = pneg %p1610_p11  ;;  %p1267_p9 = scmp.ne.s32.totalorder %s360_s3, %s1266_s27 }
  0x48   : > { %s1271_s24 = sshll.u32 %s1432_s16, 4  ;;  %s1272_s24 = int_to_ptr.vmem [resolvable:$false] %s1271_s24 }
  0x49   : > { %p1269_p13 = pnand %p1267_p9, %p1255_p1  ;;  %s1273_s28 = scalar_lea.vmem %s1272_s24, 256 }
  0x4a   : > { %p1274_p4 = scmp.lt.s32.totalorder %s360_s3, %s1272_s24  ;;  %p1275_p6 = scmp.lt.s32.totalorder %s1273_s28, %s1266_s27 }
  0x4b   : > { %p1270_p2 = pneg %p1269_p13 }
  0x4c   : > { %p1276_p12 = por %p1275_p6, %p1274_p4 }
  0x4e   : > { %p1277_p0 = pnand %p1276_p12, %p1270_p2 }
  0x50   : > { %1280 = shalt.err (!%p1277_p0)
}
  0x51   : > { %1096 = dma.hbm_to_vmem [thread:$0]  (!%p1610_p11), %s357_s23, 128, %s360_s3, %s348_s18  }
  0x52   : > { %368 = sbr.rel (%p1545_p8) target bundleno = 478 (0x1de), region = 48  ;;  %s1621_s1 = sand.u32 (!%p1545_p8), 1, %s1409_s10  }
  0x53   : > { %s979_s25 = sshll.u32 (!%p1545_p8), %s1621_s1, 3  ;;  %s371_s26 = scalar_lea.sflag (!%p1545_p8), [#allocation3], %s1621_s1 }
  0x54   : > { %s1625_s21 = scalar_lea.vmem (!%p1545_p8), [#allocation2], %s979_s25  ;;  %p1848_p3 = scmp.ne.s32.totalorder (!%p1545_p8), %s1836_s17, 0 }
  0x57   : > { %1384 = dma.done.wait (%p1848_p3), %s371_s26, 128  }
  0x58   : > { %1386 = vsyncadd (%p1848_p3), %s371_s26, 4294967168  ;;  %p1849_p10 = scmp.eq.s32.totalorder %s1524_s15, 0 }
  0x5a   : > { %1388 = dma.done.wait (%p1849_p10), [#allocation6], 1024   ;;  %p1850_p8 = pmov %p1849_p10 }
  0x5c   : > { %1390 = vsyncadd (%p1850_p8), [#allocation6], 4294966272  ;;  %p1851_p7 = pmov %p1850_p8 }
  0x5e   : > { %1392 = dma.done.wait (%p1851_p7), [#allocation9], 512   ;;  %p1852_p11 = pmov %p1851_p7 }
  0x5f   : > { %v1433_v0 = vmov 0.0   ;;  %vm1434_vm0 = vmmov 0   ;;  %v435_v1 = vld [vmem:[#allocation5 + $0x18] sm:$0xff]  ;;  %v434_v3 = vld [vmem:[#allocation5 + $0x10] sm:$0xff]  ;;  %v433_v5 = vld [vmem:[#allocation5 + $0x8] sm:$0xff]  ;;  %vm443_vm1 = vcmask 261120  }
  0x60   : > { %1394 = vsyncadd (%p1852_p11), [#allocation9], 4294966784  ;;  %1030 = vmatprep.subr.mxu0 %v1433_v0  ;;  %1041 = vmatprep.subr.mxu1 %v1433_v0  ;;  %v521_v2 = vld [vmem:[#allocation7 + $0x18] sm:$0xff]  ;;  %v520_v4 = vld [vmem:[#allocation7 + $0x10] sm:$0xff]  ;;  %s983_s3 = sshll.u32 %s1621_s1, 5  ;;  %vm680_vm2 = vcmask 64512  }
  0x61   : > { %1038 = vmatprep.mubr.msk.f32.mxu0 %vm1434_vm0, %v1433_v0  ;;  %1049 = vmatprep.mubr.msk.f32.mxu1 %vm1434_vm0, %v1433_v0  ;;  %v519_v6 = vld [vmem:[#allocation7 + $0x8] sm:$0xff]  ;;  %v432_v7 = vld [vmem:[#allocation5] sm:$0xff]  ;;  %v431_v9 = vld [vmem:[%s1625_s21] sm:$0xff]  ;;  %s1653_s24 = scalar_lea.vmem [#allocation11], %s983_s3  ;;  %s1435_s20 = smov 104  }
  0x62   : > { %1031 = vmatpush3.msra.mxu0 %v435_v1  ;;  %1042 = vmatpush3.msra.mxu1 %v521_v2  ;;  %v518_v8 = vld [vmem:[#allocation7] sm:$0xff]  ;;  %v602_v10 = vld [vmem:[#allocation8 + $0x18] sm:$0xff]  ;;  %v601_v11 = vld [vmem:[#allocation8 + $0x10] sm:$0xff]  ;;  %s1436_s23 = smov 120   ;;  %s1657_s27 = scalar_lea.vmem [#allocation10], %s983_s3 }
  0x63   : > { %1032 = vmatprep.subr.mxu0 %v1433_v0  ;;  %1043 = vmatprep.subr.mxu1 %v1433_v0  ;;  %v600_v12 = vld [vmem:[#allocation8 + $0x8] sm:$0xff]  ;;  %v599_v13 = vld [vmem:[#allocation8] sm:$0xff]  ;;  %v986_v14 = vld [vmem:[%s1820_s2] ss:$0 sm:$0xff]  ;;  %s1437_s16 = smov 112   ;;  %s1664_s26 = scalar_lea.vmem [#allocation13], %s983_s3 }
  0x64   : > { %1033 = vmatpush3.msra.mxu0 %v434_v3  ;;  %1044 = vmatpush3.msra.mxu1 %v520_v4  ;;  %v988_v15 = vld [vmem:[%s1822_s4] ss:$0 sm:$0xff]  ;;  %s774_s21 = sshll.u32 %s1653_s24, 4  ;;  %s737_s5 = sand.u32 1, %s1524_s15   ;;  %s1673_s21 = int_to_ptr.vmem [resolvable:$true] %s774_s21 }
  0x65   : > { %1034 = vmatprep.subr.mxu0 %v1433_v0  ;;  %1045 = vmatprep.subr.mxu1 %v1433_v0  ;;  %v990_v23 = vld [vmem:[%s1824_s6] ss:$0 sm:$0xff]  ;;  %s1671_s17 = sshll.u32 %s1417_s12, 9  ;;  %s1689_s12 = scalar_lea.sflag [#allocation12], %s737_s5 }
  0x66   : > { %1035 = vmatpush3.msra.mxu0 %v433_v5  ;;  %1046 = vmatpush3.msra.mxu1 %v519_v6  ;;  %s1683_s19 = scalar_lea.hbm %s1826_s8, %s1671_s17  ;;  %s1281_s15 = scalar_lea.vmem %s1673_s21, 512 }
  0x67   : > { %1036 = vmatprep.subr.mxu0 %v1433_v0  ;;  %1047 = vmatprep.subr.mxu1 %v1433_v0  ;;  %p1282_p1 = scmp.ne.s32.totalorder %s1673_s21, %s1281_s15 }
  0x68   : > { %1037 = vmatpush3.msra.mxu0 %v432_v7  ;;  %1048 = vmatpush3.msra.mxu1 %v518_v8 }
  0x69   : > { %1039 = vmatmul.mubr.msk.f32.vlgmr.msra.gmra.mxu0 %vm443_vm1, %v431_v9  ;;  %1050 = vmatmul.mubr.msk.f32.vlgmr.msra.gmra.mxu1 %vm443_vm1, %v431_v9  ;;  %p1283_p9 = pnand %p1282_p1, %p1591_p5 }
  0x6a   : > { %1052 = vmatprep.subr.mxu0 %v1433_v0  ;;  %1060 = vmatprep.mubr.msk.f32.mxu0 %vm1434_vm0, %v1433_v0 }
  0x6b   : > { %1053 = vmatpush3.msra.mxu0 %v602_v10  ;;  %p1284_p13 = pneg %p1283_p9 }
  0x6c   : > { %1054 = vmatprep.subr.mxu0 %v1433_v0 }
  0x6d   : > { %1055 = vmatpush3.msra.mxu0 %v601_v11 }
  0x6e   : > { %1056 = vmatprep.subr.mxu0 %v1433_v0 }
  0x6f   : > { %1057 = vmatpush3.msra.mxu0 %v600_v12 }
  0x70   : > { %1058 = vmatprep.subr.mxu0 %v1433_v0 }
  0x71   : > { %1059 = vmatpush3.msra.mxu0 %v599_v13 }
  0x72   : > { %1061 = vmatmul.mubr.msk.f32.vlgmr.msra.gmra.mxu0 %vm443_vm1, %v431_v9 }
 0x129   : > { %v513_v16 = vpop.f32.mrf.mxu0  ;;  %v595_v17 = vpop.f32.mrf.mxu1 }
 0x12a   : > { %v514_v18 = vadd.f32 %v986_v14, %v513_v16  ;;  %v596_v19 = vadd.f32 %v988_v15, %v595_v17 }
 0x12b   : > { %v1040_v20 = vpop.f32.mrf.mxu0  ;;  %v1051_v21 = vpop.f32.mrf.mxu1 }
 0x12c   : > { %v517_v22 = vmul.f32 0.35355338, %v514_v18  ;;  %682 = vst.msk [vmem:[%s1653_s24] sm:$0xff] %vm680_vm2, %v596_v19  ;;  %722 = vrot.lane.b32.xlu1 %v596_v19, %s1435_s20  ;;  %691 = vrot.lane.b32.xlu0 %v596_v19, %s1436_s23 }
 0x12e   : > { %681 = vst.msk [vmem:[%s1657_s27] sm:$0xff] %vm680_vm2, %v517_v22 }
 0x130   : > { %707 = vrot.lane.b32.xlu0 %v596_v19, %s1437_s16  ;;  %685 = vrot.lane.b32.xlu1 %v517_v22, %s1436_s23 }
 0x132   : > { %v676_v24 = vpop.f32.mrf.mxu0 }
 0x133   : > { %v677_v25 = vadd.f32 %v990_v23, %v676_v24 }
 0x134   : > { %v1062_v26 = vpop.f32.mrf.mxu0  ;;  %702 = vrot.lane.b32.xlu1 %v517_v22, %s1437_s16 }
 0x135   : > { %683 = vst.msk [vmem:[%s1664_s26] sm:$0xff] %vm680_vm2, %v677_v25  ;;  %697 = vrot.lane.b32.xlu0 %v677_v25, %s1436_s23 }
 0x138   : > { %717 = vrot.lane.b32.xlu1 %v517_v22, %s1435_s20 }
 0x139   : > { %712 = vrot.lane.b32.xlu0 %v677_v25, %s1437_s16 }
 0x13d   : > { %727 = vrot.lane.b32.xlu0 %v677_v25, %s1435_s20  ;;  %s1438_s20 = smov [#allocation11]  }
 0x13e   : > { %s1285_s23 = sshll.u32 %s1438_s20, 4  ;;  %s1286_s23 = int_to_ptr.vmem [resolvable:$false] %s1285_s23 }
 0x13f   : > { %s1287_s16 = scalar_lea.vmem %s1286_s23, 1024  ;;  %p1288_p2 = scmp.lt.s32.totalorder %s1673_s21, %s1286_s23 }
 0x140   : > { %p1289_p4 = scmp.lt.s32.totalorder %s1287_s16, %s1281_s15 }
 0x142   : > { %p1290_p6 = por %p1289_p4, %p1288_p2 }
 0x144   : > { %p1291_p12 = pnand %p1290_p6, %p1284_p13 }
 0x19e   : > { %v723_v27 = vpop.permute.xlu1 %722  ;;  %v692_v28 = vpop.permute.xlu0 %691 }
 0x19f   : > { %999 = vst.msk [vmem:[%s1653_s24 + $0x18] sm:$0xff] %vm680_vm2, %v723_v27  ;;  %993 = vst.msk [vmem:[%s1653_s24 + $0x8] sm:$0xff] %vm680_vm2, %v692_v28 }
 0x1a2   : > { %v708_v29 = vpop.permute.xlu0 %707  ;;  %v686_v30 = vpop.permute.xlu1 %685 }
 0x1a3   : > { %996 = vst.msk [vmem:[%s1653_s24 + $0x10] sm:$0xff] %vm680_vm2, %v708_v29  ;;  %992 = vst.msk [vmem:[%s1657_s27 + $0x8] sm:$0xff] %vm680_vm2, %v686_v30 }
 0x1a4   : > { %1294 = shalt.err (!%p1291_p12)
}
 0x1a5   : > { %s1295_s24 = scalar_lea.hbm %s1683_s19, 512  ;;  %s1299_s5 = scalar_lea.hbm %s1826_s8, 1024 }
 0x1a6   : > { %p1296_p0 = scmp.ne.s32.totalorder %s1683_s19, %s1295_s24  ;;  %p1300_p8 = scmp.lt.s32.totalorder %s1683_s19, %s1826_s8 }
 0x1a7   : > { %p1301_p7 = scmp.lt.s32.totalorder %s1299_s5, %s1295_s24 }
 0x1a8   : > { %p1297_p3 = pnand %p1296_p0, %p1591_p5 }
 0x1a9   : > { %p1302_p11 = por %p1301_p7, %p1300_p8 }
 0x1aa   : > { %p1298_p10 = pneg %p1297_p3 }
 0x1ac   : > { %p1303_p1 = pnand %p1302_p11, %p1298_p10 }
 0x1ae   : > { %1306 = shalt.err (!%p1303_p1)
}
 0x1af   : > { %s1439_s15 = smov 128   ;;  %s1440_s20 = smov 8   ;;  %v703_v31 = vpop.permute.xlu1 %702  ;;  %v698_v32 = vpop.permute.xlu0 %697 }
 0x1b0   : > { %1078 = dma.vmem_to_hbm [thread:$0]  (%p1591_p5), %s1673_s21, 512, %s1683_s19, %s1689_s12, %s1439_s15, %s1439_s15, %s1440_s20  }
 0x1b1   : > { %s757_s23 = sshll.u32 %s1657_s27, 4  ;;  %995 = vst.msk [vmem:[%s1657_s27 + $0x10] sm:$0xff] %vm680_vm2, %v703_v31  ;;  %994 = vst.msk [vmem:[%s1664_s26 + $0x8] sm:$0xff] %vm680_vm2, %v698_v32  ;;  %s1726_s28 = scalar_lea.hbm %s1825_s7, %s1671_s17  ;;  %s1718_s23 = int_to_ptr.vmem [resolvable:$true] %s757_s23 }
 0x1b2   : > { %s733_s19 = scalar_lea.sflag [#allocation4], %s1621_s1  ;;  %s1307_s25 = scalar_lea.vmem %s1718_s23, 512 }
 0x1b3   : > { %v718_v33 = vpop.permute.xlu1 %717  ;;  %v713_v34 = vpop.permute.xlu0 %712  ;;  %p1308_p9 = scmp.ne.s32.totalorder %s1718_s23, %s1307_s25  ;;  %s1441_s5 = smov [#allocation10]  }
 0x1b4   : > { %998 = vst.msk [vmem:[%s1657_s27 + $0x18] sm:$0xff] %vm680_vm2, %v718_v33  ;;  %997 = vst.msk [vmem:[%s1664_s26 + $0x10] sm:$0xff] %vm680_vm2, %v713_v34  ;;  %s1311_s3 = sshll.u32 %s1441_s5, 4  ;;  %s1312_s3 = int_to_ptr.vmem [resolvable:$false] %s1311_s3 }
 0x1b5   : > { %p1309_p13 = pnand %p1308_p9, %p1591_p5  ;;  %s1313_s18 = scalar_lea.vmem %s1312_s3, 1024 }
 0x1b6   : > { %p1314_p4 = scmp.lt.s32.totalorder %s1718_s23, %s1312_s3  ;;  %p1315_p6 = scmp.lt.s32.totalorder %s1313_s18, %s1307_s25 }
 0x1b7   : > { %p1310_p2 = pneg %p1309_p13 }
 0x1b8   : > { %p1316_p12 = por %p1315_p6, %p1314_p4 }
 0x1ba   : > { %p1317_p0 = pnand %p1316_p12, %p1310_p2 }
 0x1bc   : > { %1320 = shalt.err (!%p1317_p0)
}
 0x1bd   : > { %s1321_s27 = scalar_lea.hbm %s1726_s28, 512  ;;  %s1325_s24 = scalar_lea.hbm %s1825_s7, 1024 }
 0x1be   : > { %p1322_p3 = scmp.ne.s32.totalorder %s1726_s28, %s1321_s27  ;;  %p1326_p7 = scmp.lt.s32.totalorder %s1726_s28, %s1825_s7 }
 0x1bf   : > { %p1327_p11 = scmp.lt.s32.totalorder %s1325_s24, %s1321_s27 }
 0x1c0   : > { %p1323_p10 = pnand %p1322_p3, %p1591_p5 }
 0x1c1   : > { %p1328_p1 = por %p1327_p11, %p1326_p7 }
 0x1c2   : > { %p1324_p8 = pneg %p1323_p10 }
 0x1c4   : > { %p1329_p9 = pnand %p1328_p1, %p1324_p8 }
 0x1c6   : > { %1332 = shalt.err (!%p1329_p9)
}
 0x1c7   : > { %1077 = dma.vmem_to_hbm [thread:$0]  (%p1591_p5), %s1718_s23, 512, %s1726_s28, %s733_s19, %s1439_s15, %s1439_s15, %s1440_s20   ;;  %v728_v35 = vpop.permute.xlu0 %727 }
 0x1c8   : > { %s1853_s25 = sshll.u32 %s1664_s26, 4  ;;  %s1765_s18 = scalar_lea.hbm %s1827_s9, %s1671_s17  ;;  %1000 = vst.msk [vmem:[%s1664_s26 + $0x18] sm:$0xff] %vm680_vm2, %v728_v35  ;;  %s1759_s25 = int_to_ptr.vmem [resolvable:$true] %s1853_s25 }
 0x1c9   : > { %s1333_s27 = scalar_lea.vmem %s1759_s25, 512  ;;  %s1442_s23 = smov [#allocation13]  }
 0x1ca   : > { %p1334_p13 = scmp.ne.s32.totalorder %s1759_s25, %s1333_s27  ;;  %s1337_s28 = sshll.u32 %s1442_s23, 4  ;;  %s1338_s28 = int_to_ptr.vmem [resolvable:$false] %s1337_s28 }
 0x1cb   : > { %s1339_s19 = scalar_lea.vmem %s1338_s28, 1024  ;;  %p1340_p6 = scmp.lt.s32.totalorder %s1759_s25, %s1338_s28 }
 0x1cc   : > { %p1335_p2 = pnand %p1334_p13, %p1591_p5  ;;  %p1341_p12 = scmp.lt.s32.totalorder %s1339_s19, %s1333_s27 }
 0x1ce   : > { %p1336_p4 = pneg %p1335_p2  ;;  %p1342_p0 = por %p1341_p12, %p1340_p6 }
 0x1d0   : > { %p1343_p3 = pnand %p1342_p0, %p1336_p4 }
 0x1d2   : > { %1346 = shalt.err (!%p1343_p3)
}
 0x1d3   : > { %s1347_s17 = scalar_lea.hbm %s1765_s18, 512  ;;  %s1351_s16 = scalar_lea.hbm %s1827_s9, 1024 }
 0x1d4   : > { %p1348_p10 = scmp.ne.s32.totalorder %s1765_s18, %s1347_s17  ;;  %p1352_p11 = scmp.lt.s32.totalorder %s1765_s18, %s1827_s9 }
 0x1d5   : > { %p1353_p1 = scmp.lt.s32.totalorder %s1351_s16, %s1347_s17 }
 0x1d6   : > { %p1349_p8 = pnand %p1348_p10, %p1591_p5 }
 0x1d7   : > { %p1354_p9 = por %p1353_p1, %p1352_p11 }
 0x1d8   : > { %p1350_p7 = pneg %p1349_p8 }
 0x1da   : > { %p1355_p13 = pnand %p1354_p9, %p1350_p7 }
 0x1dc   : > { %1358 = shalt.err (!%p1355_p13)
}
 0x1dd   : > { %1079 = dma.vmem_to_hbm [thread:$0]  (%p1591_p5), %s1759_s25, 512, %s1765_s18, %s1689_s12, %s1439_s15, %s1439_s15, %s1440_s20  }
 0x1de PF: > { %s1854_s21 = sld [smem:[#allocation19_spill]]  ;;  %s806_s3 = sand.u32 1, %s1405_s30  }
 0x1df   : > { %p1856_p4 = scmp.ge.s32.totalorder %s1425_s14, 2  ;;  %s807_s27 = scalar_lea.sflag [#allocation4], %s806_s3 }
 0x1e4   : > { %p1855_p2 = scmp.ne.s32.totalorder %s1854_s21, 0 }
 0x1e6   : > { %p1098_p6 = pnand %p1856_p4, %p1855_p2 }
 0x1e8   : > { %p1099_p12 = pneg %p1098_p6 }
 0x1ea   : > { %1396 = dma.done.wait (%p1099_p12), %s807_s27, 512  }
 0x1eb   : > { %1398 = vsyncadd (%p1099_p12), %s807_s27, 4294966784  ;;  %s1857_s22 = sadd.s32 4294967294, %s1425_s14  }
 0x1ec   : > { %s815_s23 = sand.u32 1, %s1857_s22  }
 0x1ed   : > { %s816_s28 = scalar_lea.sflag [#allocation12], %s815_s23 }
 0x1ee   : > { %1400 = dma.done.wait (%p1099_p12), %s816_s28, 1024  }
 0x1ef   : > { %1402 = vsyncadd (%p1099_p12), %s816_s28, 4294966272  ;;  %s31_s14 = sadd.s32 1, %s1425_s14   ;;  %s1858_s15 = sld [smem:[#allocation20_spill]] }
 0x1f0   : > { %p28_p5 = scmp.ge.s32.totalorder %s31_s14, 4   ;;  %s1859_s30 = smov %s1409_s10 }
 0x1f1   : > { %s1860_s10 = smov %s1413_s11  ;;  %s1861_s11 = smov %s1603_s29 }
 0x1f2   : > { %s1862_s12 = smov %s1421_s13  ;;  %30 = sbr.rel (!%p28_p5) target bundleno = 14 (0xe), region = 146 }
 0x1f5   : > { %s1863_s13 = smov %s1858_s15 }
 0x1f7   :  { %830 = vsyncpa [#allocation3], 1 }
 0x1f8   :  { %832 = vsyncpa [#allocation3 + $0x1], 1 }
 0x1f9   :  { %833 = vsyncpa [#allocation6], 1 }
 0x1fa   :  { %834 = vsyncpa [#allocation9], 1 }
 0x1fb   :  { %835 = vsyncpa [#allocation4], 1 }
 0x1fc   :  { %837 = vsyncpa [#allocation4 + $0x1], 1 }
 0x1fd   :  { %838 = vsyncpa [#allocation12], 1 }
 0x1fe   :  { %840 = vsyncpa [#allocation12 + $0x1], 1 }

</bundles_post_ra>
